<compile_context>
chip_gen: v7x
topology: tpu7x:2x2x1
jax: 0.10.0
libtpu: 0.0.40
codegen_flags: <defaults>
</compile_context>

<pallas_src>
import math
from functools import partial

import jax
import jax.numpy as jnp
from jax import lax
from jax.experimental import pallas as pl
from jax.experimental.pallas import tpu as pltpu


def _mha_kernel(q_ref, k_ref, v_ref,
                wqt_ref, wkt_ref, wvt_ref, wot_ref,
                bq_ref, bk_ref, bv_ref, bo_ref,
                out_ref, *, n_head):
    # Each grid step handles `Bt` batch elements: activation refs are (Bt, S, D).
    Bt, S, D = q_ref.shape
    d_k = D // n_head
    scale = 1.0 / math.sqrt(d_k)
    cdt = q_ref.dtype                      # MXU compute dtype (bf16 by default)

    R = Bt * S
    xq = q_ref[...].reshape(R, D)          # fold batch into rows (lane dim = D)
    xk = k_ref[...].reshape(R, D)
    xv = v_ref[...].reshape(R, D)

    # Linear projections y = x @ W.T + b.  The *_t refs already hold W.T, so no
    # in-kernel transpose; accumulate in f32 and add the bias in f32.
    Qf = jnp.dot(xq, wqt_ref[...], preferred_element_type=jnp.float32) + bq_ref[...]
    Kf = jnp.dot(xk, wkt_ref[...], preferred_element_type=jnp.float32) + bk_ref[...]
    Vf = jnp.dot(xv, wvt_ref[...], preferred_element_type=jnp.float32) + bv_ref[...]

    # Fold 1/sqrt(d_k) into Q (R*D multiplies, not H*S*S), then drop operands to
    # the MXU dtype for the attention matmuls.
    Qc = (Qf * scale).astype(cdt)
    Kc = Kf.astype(cdt)
    Vc = Vf.astype(cdt)

    # Per-(batch, head) attention with 2-D matmuls on contiguous column slices.
    # dot_general contracts the last dims (q @ k.T) without materializing k.T.
    dn = (((1,), (1,)), ((), ()))
    rows_out = []
    for b in range(Bt):
        r0 = b * S
        head_outs = []
        for h in range(n_head):
            c0 = h * d_k
            qh = Qc[r0:r0 + S, c0:c0 + d_k]            # (S, d_k)
            kh = Kc[r0:r0 + S, c0:c0 + d_k]            # (S, d_k)
            vh = Vc[r0:r0 + S, c0:c0 + d_k]            # (S, d_k)

            s = lax.dot_general(qh, kh, dn,
                                preferred_element_type=jnp.float32)   # (S, S)
            m = jnp.max(s, axis=-1, keepdims=True)
            e = jnp.exp(s - m)                                         # f32
            inv_l = pl.reciprocal(jnp.sum(e, axis=-1, keepdims=True), approx=True)
            o = jnp.dot(e.astype(cdt), vh,
                        preferred_element_type=jnp.float32) * inv_l    # (S, d_k)
            head_outs.append(o)
        rows_out.append(jnp.concatenate(head_outs, axis=-1))           # (S, D)
    attn = jnp.concatenate(rows_out, axis=0) if Bt > 1 else rows_out[0]  # (R, D)

    # Output projection (weights pre-transposed too).
    y = jnp.dot(attn.astype(cdt), wot_ref[...],
                preferred_element_type=jnp.float32) + bo_ref[...]
    out_ref[...] = y.reshape(Bt, S, D).astype(out_ref.dtype)
    # Dropout is the identity here (inference semantics).


def multi_head_attention(q, k, v, params, n_head, *, block_b=None,
                         compute_dtype=jnp.bfloat16):
    """q, k, v: (B, S, D).  params: PyTorch-style Wq/Wk/Wv/Wo (out,in) and bq/.../bo (1,D)."""
    B, S, D = q.shape
    assert D % n_head == 0, "d_model must be divisible by n_head"

    if block_b is None:
        # Enough rows per grid step to amortize the ~0.35us step overhead, but
        # keep >= 2 grid steps when B > 1 so both v7x TensorCores get work.
        block_b = max(1, min(B, 256 // max(S, 1)))
        if B > 1:
            block_b = min(block_b, pl.cdiv(B, 2))
        while B % block_b:
            block_b -= 1
    n_steps = B // block_b

    cdt = jnp.dtype(compute_dtype)
    # Cast activations/weights to the MXU dtype at the boundary; pre-transpose
    # the four projection weights once (one-time layout plumbing in HBM).
    qc, kc, vc = (x.astype(cdt) for x in (q, k, v))
    wqt, wkt, wvt, wot = (params[f"W{n}"].T.astype(cdt) for n in ("q", "k", "v", "o"))
    bq, bk, bv, bo = (params[f"b{n}"].astype(jnp.float32) for n in ("q", "k", "v", "o"))

    act_spec = pl.BlockSpec((block_b, S, D), lambda b: (b, 0, 0))
    w_spec = pl.BlockSpec((D, D), lambda b: (0, 0))
    b_spec = pl.BlockSpec((1, D), lambda b: (0, 0))

    # Advisory cost estimate so XLA schedules/overlaps around the custom call.
    flops = 8 * B * S * D * D + 4 * B * S * S * D
    transcendentals = B * n_head * S * S
    bytes_accessed = ((3 * B * S * D + 4 * D * D) * cdt.itemsize
                      + 4 * D * 4                       # f32 biases
                      + B * S * D * q.dtype.itemsize)   # output

    # VMEM budget: double-buffered activations + weights + f32 projection /
    # softmax scratch; clamp into [32 MiB, 64 MiB] (v7x physical VMEM = 64 MiB).
    est = (2 * (3 * block_b * S * D + 4 * D * D) * cdt.itemsize     # dbl-buffered ins
           + 2 * block_b * S * D * 4                                # dbl-buffered out
           + 8 * block_b * S * D * 4                                # f32 Q/K/V/attn
           + 3 * S * S * 4)                                         # scores/e scratch
    vmem_limit = int(min(max(2 * est, 32 * 1024 * 1024), 64 * 1024 * 1024))

    return pl.pallas_call(
        partial(_mha_kernel, n_head=n_head),
        out_shape=jax.ShapeDtypeStruct((B, S, D), q.dtype),
        grid_spec=pltpu.PrefetchScalarGridSpec(
            num_scalar_prefetch=0,
            grid=(n_steps,),
            in_specs=[act_spec, act_spec, act_spec,
                      w_spec, w_spec, w_spec, w_spec,
                      b_spec, b_spec, b_spec, b_spec],
            out_specs=act_spec,
        ),
        compiler_params=pltpu.CompilerParams(
            dimension_semantics=("parallel",),
            vmem_limit_bytes=vmem_limit),
        cost_estimate=pl.CostEstimate(flops=int(flops),
                                      transcendentals=int(transcendentals),
                                      bytes_accessed=int(bytes_accessed)),
    )(qc, kc, vc, wqt, wkt, wvt, wot, bq, bk, bv, bo)


def mha_reference(q, k, v, params, n_head):
    """Pure-JAX f32 reference mirroring the PyTorch module (dropout = identity)."""
    B, S, D = q.shape
    d_k = D // n_head

    def lin(x, W, b):
        return x @ W.T + b[0]

    def split(x):  # (B, S, D) -> (B, H, S, d_k)
        return x.reshape(B, S, n_head, d_k).transpose(0, 2, 1, 3)

    Q = split(lin(q, params["Wq"], params["bq"]))
    K = split(lin(k, params["Wk"], params["bk"]))
    V = split(lin(v, params["Wv"], params["bv"]))

    scores = jnp.einsum('bhqd,bhkd->bhqk', Q, K) / math.sqrt(d_k)
    probs = jax.nn.softmax(scores, axis=-1)
    out = jnp.einsum('bhqk,bhkd->bhqd', probs, V)
    out = out.transpose(0, 2, 1, 3).reshape(B, S, D)
    return lin(out, params["Wo"], params["bo"])


def init_params(key, d_model):
    """PyTorch nn.Linear default init: uniform(+-1/sqrt(fan_in))."""
    bound = 1.0 / math.sqrt(d_model)
    keys = jax.random.split(key, 8)
    p = {}
    for i, name in enumerate(["q", "k", "v", "o"]):
        p[f"W{name}"] = jax.random.uniform(
            keys[2 * i], (d_model, d_model), jnp.float32, -bound, bound)
        p[f"b{name}"] = jax.random.uniform(
            keys[2 * i + 1], (1, d_model), jnp.float32, -bound, bound)
    return p


if __name__ == "__main__":
    B, S, D, H = 2, 8, 32, 4  # batch, seq, d_model, n_head  (d_k = 8)

    key = jax.random.PRNGKey(0)
    k_p, k_q, k_k, k_v = jax.random.split(key, 4)

    params = init_params(k_p, D)
    q = jax.random.normal(k_q, (B, S, D), jnp.float32)
    k = jax.random.normal(k_k, (B, S, D), jnp.float32)
    v = jax.random.normal(k_v, (B, S, D), jnp.float32)

    ref = mha_reference(q, k, v, params, H)

    # Exact-semantics check: f32 compute path (approx reciprocal is the only
    # deviation from the reference).
    out_f32 = multi_head_attention(q, k, v, params, H, compute_dtype=jnp.float32)
    out_f32 = jax.block_until_ready(out_f32)
    assert out_f32.shape == (B, S, D)
    assert jnp.allclose(out_f32, ref, atol=1e-2, rtol=1e-2), "f32 kernel mismatch"

    # Default (bf16 MXU) performance path.
    out = multi_head_attention(q, k, v, params, H)
    out = jax.block_until_ready(out)
    assert out.shape == (B, S, D)
    assert jnp.allclose(out, ref, atol=1e-1, rtol=1e-1), "bf16 kernel mismatch"

    print("KERNEL_OK")
</pallas_src>

<mosaic_0001>
module attributes {stable_mosaic.version = 11 : i64} {
  func.func @_mha_kernel(%arg0: i32, %arg1: memref<1x8x32xf32, #tpu.memory_space<vmem>>, %arg2: memref<1x8x32xf32, #tpu.memory_space<vmem>>, %arg3: memref<1x8x32xf32, #tpu.memory_space<vmem>>, %arg4: memref<32x32xf32, #tpu.memory_space<vmem>>, %arg5: memref<32x32xf32, #tpu.memory_space<vmem>>, %arg6: memref<32x32xf32, #tpu.memory_space<vmem>>, %arg7: memref<32x32xf32, #tpu.memory_space<vmem>>, %arg8: memref<1x32xf32, #tpu.memory_space<vmem>>, %arg9: memref<1x32xf32, #tpu.memory_space<vmem>>, %arg10: memref<1x32xf32, #tpu.memory_space<vmem>>, %arg11: memref<1x32xf32, #tpu.memory_space<vmem>>, %arg12: memref<1x8x32xf32, #tpu.memory_space<vmem>>) attributes {dimension_semantics = [#tpu.dimension_semantics<parallel>], iteration_bounds = array<i64: 2>, scalar_prefetch = 0 : i64, scratch_operands = 0 : i64, tpu.core_type = #tpu.core_type<tc>, window_params = [{transform_indices = @transform_0, window_bounds = array<i64: 1, 8, 32>}, {transform_indices = @transform_1, window_bounds = array<i64: 1, 8, 32>}, {transform_indices = @transform_2, window_bounds = array<i64: 1, 8, 32>}, {pipeline_mode = #tpu.pipeline_mode<synchronous>, transform_indices = @transform_3, window_bounds = array<i64: 32, 32>}, {pipeline_mode = #tpu.pipeline_mode<synchronous>, transform_indices = @transform_4, window_bounds = array<i64: 32, 32>}, {pipeline_mode = #tpu.pipeline_mode<synchronous>, transform_indices = @transform_5, window_bounds = array<i64: 32, 32>}, {pipeline_mode = #tpu.pipeline_mode<synchronous>, transform_indices = @transform_6, window_bounds = array<i64: 32, 32>}, {pipeline_mode = #tpu.pipeline_mode<synchronous>, transform_indices = @transform_7, window_bounds = array<i64: 1, 32>}, {pipeline_mode = #tpu.pipeline_mode<synchronous>, transform_indices = @transform_8, window_bounds = array<i64: 1, 32>}, {pipeline_mode = #tpu.pipeline_mode<synchronous>, transform_indices = @transform_9, window_bounds = array<i64: 1, 32>}, {pipeline_mode = #tpu.pipeline_mode<synchronous>, transform_indices = @transform_10, window_bounds = array<i64: 1, 32>}, {transform_indices = @transform_11, window_bounds = array<i64: 1, 8, 32>}]} {
    %c0 = arith.constant 0 : index
    %c0_0 = arith.constant 0 : index
    %c0_1 = arith.constant 0 : index
    %0 = vector.load %arg1[%c0, %c0_0, %c0_1] : memref<1x8x32xf32, #tpu.memory_space<vmem>>, vector<1x8x32xf32>
    %1 = vector.shape_cast %0 : vector<1x8x32xf32> to vector<8x32xf32>
    %c0_2 = arith.constant 0 : index
    %c0_3 = arith.constant 0 : index
    %c0_4 = arith.constant 0 : index
    %2 = vector.load %arg2[%c0_2, %c0_3, %c0_4] : memref<1x8x32xf32, #tpu.memory_space<vmem>>, vector<1x8x32xf32>
    %3 = vector.shape_cast %2 : vector<1x8x32xf32> to vector<8x32xf32>
    %c0_5 = arith.constant 0 : index
    %c0_6 = arith.constant 0 : index
    %c0_7 = arith.constant 0 : index
    %4 = vector.load %arg3[%c0_5, %c0_6, %c0_7] : memref<1x8x32xf32, #tpu.memory_space<vmem>>, vector<1x8x32xf32>
    %5 = vector.shape_cast %4 : vector<1x8x32xf32> to vector<8x32xf32>
    %c0_8 = arith.constant 0 : index
    %c0_9 = arith.constant 0 : index
    %6 = vector.load %arg4[%c0_8, %c0_9] : memref<32x32xf32, #tpu.memory_space<vmem>>, vector<32x32xf32>
    %cst = arith.constant dense<0.000000e+00> : vector<8x32xf32>
    %7 = tpu.matmul %1, %6, %cst {dimension_numbers = #tpu.dot_dimension_numbers<[1], [0], [0], [1], [0, 0, 1, 1], [], []>} : vector<8x32xf32>, vector<32x32xf32>, vector<8x32xf32> -> vector<8x32xf32>
    %c0_10 = arith.constant 0 : index
    %c0_11 = arith.constant 0 : index
    %8 = vector.load %arg8[%c0_10, %c0_11] : memref<1x32xf32, #tpu.memory_space<vmem>>, vector<1x32xf32>
    %9 = vector.broadcast %8 : vector<1x32xf32> to vector<8x32xf32>
    %10 = arith.addf %7, %9 : vector<8x32xf32>
    %c0_12 = arith.constant 0 : index
    %c0_13 = arith.constant 0 : index
    %11 = vector.load %arg5[%c0_12, %c0_13] : memref<32x32xf32, #tpu.memory_space<vmem>>, vector<32x32xf32>
    %cst_14 = arith.constant dense<0.000000e+00> : vector<8x32xf32>
    %12 = tpu.matmul %3, %11, %cst_14 {dimension_numbers = #tpu.dot_dimension_numbers<[1], [0], [0], [1], [0, 0, 1, 1], [], []>} : vector<8x32xf32>, vector<32x32xf32>, vector<8x32xf32> -> vector<8x32xf32>
    %c0_15 = arith.constant 0 : index
    %c0_16 = arith.constant 0 : index
    %13 = vector.load %arg9[%c0_15, %c0_16] : memref<1x32xf32, #tpu.memory_space<vmem>>, vector<1x32xf32>
    %14 = vector.broadcast %13 : vector<1x32xf32> to vector<8x32xf32>
    %15 = arith.addf %12, %14 : vector<8x32xf32>
    %c0_17 = arith.constant 0 : index
    %c0_18 = arith.constant 0 : index
    %16 = vector.load %arg6[%c0_17, %c0_18] : memref<32x32xf32, #tpu.memory_space<vmem>>, vector<32x32xf32>
    %cst_19 = arith.constant dense<0.000000e+00> : vector<8x32xf32>
    %17 = tpu.matmul %5, %16, %cst_19 {dimension_numbers = #tpu.dot_dimension_numbers<[1], [0], [0], [1], [0, 0, 1, 1], [], []>} : vector<8x32xf32>, vector<32x32xf32>, vector<8x32xf32> -> vector<8x32xf32>
    %c0_20 = arith.constant 0 : index
    %c0_21 = arith.constant 0 : index
    %18 = vector.load %arg10[%c0_20, %c0_21] : memref<1x32xf32, #tpu.memory_space<vmem>>, vector<1x32xf32>
    %19 = vector.broadcast %18 : vector<1x32xf32> to vector<8x32xf32>
    %20 = arith.addf %17, %19 : vector<8x32xf32>
    %cst_22 = arith.constant 0.353553385 : f32
    %21 = vector.broadcast %cst_22 : f32 to vector<8x32xf32>
    %22 = arith.mulf %10, %21 : vector<8x32xf32>
    %23 = vector.extract_strided_slice %22 {offsets = [0, 0], sizes = [8, 8], strides = [1, 1]} : vector<8x32xf32> to vector<8x8xf32>
    %24 = vector.extract_strided_slice %15 {offsets = [0, 0], sizes = [8, 8], strides = [1, 1]} : vector<8x32xf32> to vector<8x8xf32>
    %25 = vector.extract_strided_slice %20 {offsets = [0, 0], sizes = [8, 8], strides = [1, 1]} : vector<8x32xf32> to vector<8x8xf32>
    %cst_23 = arith.constant dense<0.000000e+00> : vector<8x8xf32>
    %26 = tpu.matmul %23, %24, %cst_23 {dimension_numbers = #tpu.dot_dimension_numbers<[1], [1], [0], [0], [0, 0, 1, 0], [], []>} : vector<8x8xf32>, vector<8x8xf32>, vector<8x8xf32> -> vector<8x8xf32>
    %cst_24 = arith.constant dense<0xFF800000> : vector<8xf32>
    %27 = vector.multi_reduction <maximumf>, %26, %cst_24 [1] : vector<8x8xf32> to vector<8xf32>
    %28 = vector.shape_cast %27 : vector<8xf32> to vector<8x1xf32>
    %29 = vector.broadcast %28 : vector<8x1xf32> to vector<8x8xf32>
    %30 = arith.subf %26, %29 : vector<8x8xf32>
    %31 = math.exp %30 : vector<8x8xf32>
    %cst_25 = arith.constant dense<0.000000e+00> : vector<8xf32>
    %32 = vector.multi_reduction <add>, %31, %cst_25 [1] : vector<8x8xf32> to vector<8xf32>
    %33 = vector.shape_cast %32 : vector<8xf32> to vector<8x1xf32>
    %34 = tpu.reciprocal %33 {approx = true} : vector<8x1xf32> -> vector<8x1xf32>
    %cst_26 = arith.constant dense<0.000000e+00> : vector<8x8xf32>
    %35 = tpu.matmul %31, %25, %cst_26 {dimension_numbers = #tpu.dot_dimension_numbers<[1], [0], [0], [1], [0, 0, 1, 1], [], []>} : vector<8x8xf32>, vector<8x8xf32>, vector<8x8xf32> -> vector<8x8xf32>
    %36 = vector.broadcast %34 : vector<8x1xf32> to vector<8x8xf32>
    %37 = arith.mulf %35, %36 : vector<8x8xf32>
    %38 = vector.extract_strided_slice %22 {offsets = [0, 8], sizes = [8, 8], strides = [1, 1]} : vector<8x32xf32> to vector<8x8xf32>
    %39 = vector.extract_strided_slice %15 {offsets = [0, 8], sizes = [8, 8], strides = [1, 1]} : vector<8x32xf32> to vector<8x8xf32>
    %40 = vector.extract_strided_slice %20 {offsets = [0, 8], sizes = [8, 8], strides = [1, 1]} : vector<8x32xf32> to vector<8x8xf32>
    %cst_27 = arith.constant dense<0.000000e+00> : vector<8x8xf32>
    %41 = tpu.matmul %38, %39, %cst_27 {dimension_numbers = #tpu.dot_dimension_numbers<[1], [1], [0], [0], [0, 0, 1, 0], [], []>} : vector<8x8xf32>, vector<8x8xf32>, vector<8x8xf32> -> vector<8x8xf32>
    %cst_28 = arith.constant dense<0xFF800000> : vector<8xf32>
    %42 = vector.multi_reduction <maximumf>, %41, %cst_28 [1] : vector<8x8xf32> to vector<8xf32>
    %43 = vector.shape_cast %42 : vector<8xf32> to vector<8x1xf32>
    %44 = vector.broadcast %43 : vector<8x1xf32> to vector<8x8xf32>
    %45 = arith.subf %41, %44 : vector<8x8xf32>
    %46 = math.exp %45 : vector<8x8xf32>
    %cst_29 = arith.constant dense<0.000000e+00> : vector<8xf32>
    %47 = vector.multi_reduction <add>, %46, %cst_29 [1] : vector<8x8xf32> to vector<8xf32>
    %48 = vector.shape_cast %47 : vector<8xf32> to vector<8x1xf32>
    %49 = tpu.reciprocal %48 {approx = true} : vector<8x1xf32> -> vector<8x1xf32>
    %cst_30 = arith.constant dense<0.000000e+00> : vector<8x8xf32>
    %50 = tpu.matmul %46, %40, %cst_30 {dimension_numbers = #tpu.dot_dimension_numbers<[1], [0], [0], [1], [0, 0, 1, 1], [], []>} : vector<8x8xf32>, vector<8x8xf32>, vector<8x8xf32> -> vector<8x8xf32>
    %51 = vector.broadcast %49 : vector<8x1xf32> to vector<8x8xf32>
    %52 = arith.mulf %50, %51 : vector<8x8xf32>
    %53 = vector.extract_strided_slice %22 {offsets = [0, 16], sizes = [8, 8], strides = [1, 1]} : vector<8x32xf32> to vector<8x8xf32>
    %54 = vector.extract_strided_slice %15 {offsets = [0, 16], sizes = [8, 8], strides = [1, 1]} : vector<8x32xf32> to vector<8x8xf32>
    %55 = vector.extract_strided_slice %20 {offsets = [0, 16], sizes = [8, 8], strides = [1, 1]} : vector<8x32xf32> to vector<8x8xf32>
    %cst_31 = arith.constant dense<0.000000e+00> : vector<8x8xf32>
    %56 = tpu.matmul %53, %54, %cst_31 {dimension_numbers = #tpu.dot_dimension_numbers<[1], [1], [0], [0], [0, 0, 1, 0], [], []>} : vector<8x8xf32>, vector<8x8xf32>, vector<8x8xf32> -> vector<8x8xf32>
    %cst_32 = arith.constant dense<0xFF800000> : vector<8xf32>
    %57 = vector.multi_reduction <maximumf>, %56, %cst_32 [1] : vector<8x8xf32> to vector<8xf32>
    %58 = vector.shape_cast %57 : vector<8xf32> to vector<8x1xf32>
    %59 = vector.broadcast %58 : vector<8x1xf32> to vector<8x8xf32>
    %60 = arith.subf %56, %59 : vector<8x8xf32>
    %61 = math.exp %60 : vector<8x8xf32>
    %cst_33 = arith.constant dense<0.000000e+00> : vector<8xf32>
    %62 = vector.multi_reduction <add>, %61, %cst_33 [1] : vector<8x8xf32> to vector<8xf32>
    %63 = vector.shape_cast %62 : vector<8xf32> to vector<8x1xf32>
    %64 = tpu.reciprocal %63 {approx = true} : vector<8x1xf32> -> vector<8x1xf32>
    %cst_34 = arith.constant dense<0.000000e+00> : vector<8x8xf32>
    %65 = tpu.matmul %61, %55, %cst_34 {dimension_numbers = #tpu.dot_dimension_numbers<[1], [0], [0], [1], [0, 0, 1, 1], [], []>} : vector<8x8xf32>, vector<8x8xf32>, vector<8x8xf32> -> vector<8x8xf32>
    %66 = vector.broadcast %64 : vector<8x1xf32> to vector<8x8xf32>
    %67 = arith.mulf %65, %66 : vector<8x8xf32>
    %68 = vector.extract_strided_slice %22 {offsets = [0, 24], sizes = [8, 8], strides = [1, 1]} : vector<8x32xf32> to vector<8x8xf32>
    %69 = vector.extract_strided_slice %15 {offsets = [0, 24], sizes = [8, 8], strides = [1, 1]} : vector<8x32xf32> to vector<8x8xf32>
    %70 = vector.extract_strided_slice %20 {offsets = [0, 24], sizes = [8, 8], strides = [1, 1]} : vector<8x32xf32> to vector<8x8xf32>
    %cst_35 = arith.constant dense<0.000000e+00> : vector<8x8xf32>
    %71 = tpu.matmul %68, %69, %cst_35 {dimension_numbers = #tpu.dot_dimension_numbers<[1], [1], [0], [0], [0, 0, 1, 0], [], []>} : vector<8x8xf32>, vector<8x8xf32>, vector<8x8xf32> -> vector<8x8xf32>
    %cst_36 = arith.constant dense<0xFF800000> : vector<8xf32>
    %72 = vector.multi_reduction <maximumf>, %71, %cst_36 [1] : vector<8x8xf32> to vector<8xf32>
    %73 = vector.shape_cast %72 : vector<8xf32> to vector<8x1xf32>
    %74 = vector.broadcast %73 : vector<8x1xf32> to vector<8x8xf32>
    %75 = arith.subf %71, %74 : vector<8x8xf32>
    %76 = math.exp %75 : vector<8x8xf32>
    %cst_37 = arith.constant dense<0.000000e+00> : vector<8xf32>
    %77 = vector.multi_reduction <add>, %76, %cst_37 [1] : vector<8x8xf32> to vector<8xf32>
    %78 = vector.shape_cast %77 : vector<8xf32> to vector<8x1xf32>
    %79 = tpu.reciprocal %78 {approx = true} : vector<8x1xf32> -> vector<8x1xf32>
    %cst_38 = arith.constant dense<0.000000e+00> : vector<8x8xf32>
    %80 = tpu.matmul %76, %70, %cst_38 {dimension_numbers = #tpu.dot_dimension_numbers<[1], [0], [0], [1], [0, 0, 1, 1], [], []>} : vector<8x8xf32>, vector<8x8xf32>, vector<8x8xf32> -> vector<8x8xf32>
    %81 = vector.broadcast %79 : vector<8x1xf32> to vector<8x8xf32>
    %82 = arith.mulf %80, %81 : vector<8x8xf32>
    %83 = tpu.concatenate %37, %52, %67, %82 in 1 : vector<8x8xf32>, vector<8x8xf32>, vector<8x8xf32>, vector<8x8xf32> -> vector<8x32xf32>
    %c0_39 = arith.constant 0 : index
    %c0_40 = arith.constant 0 : index
    %84 = vector.load %arg7[%c0_39, %c0_40] : memref<32x32xf32, #tpu.memory_space<vmem>>, vector<32x32xf32>
    %cst_41 = arith.constant dense<0.000000e+00> : vector<8x32xf32>
    %85 = tpu.matmul %83, %84, %cst_41 {dimension_numbers = #tpu.dot_dimension_numbers<[1], [0], [0], [1], [0, 0, 1, 1], [], []>} : vector<8x32xf32>, vector<32x32xf32>, vector<8x32xf32> -> vector<8x32xf32>
    %c0_42 = arith.constant 0 : index
    %c0_43 = arith.constant 0 : index
    %86 = vector.load %arg11[%c0_42, %c0_43] : memref<1x32xf32, #tpu.memory_space<vmem>>, vector<1x32xf32>
    %87 = vector.broadcast %86 : vector<1x32xf32> to vector<8x32xf32>
    %88 = arith.addf %85, %87 : vector<8x32xf32>
    %89 = vector.shape_cast %88 : vector<8x32xf32> to vector<1x8x32xf32>
    %c0_44 = arith.constant 0 : index
    %c0_45 = arith.constant 0 : index
    %c0_46 = arith.constant 0 : index
    %90 = vector.load %arg12[%c0_44, %c0_45, %c0_46] : memref<1x8x32xf32, #tpu.memory_space<vmem>>, vector<1x8x32xf32>
    tpu.vector_store %arg12[%c0_44, %c0_45, %c0_46], %89 {strides = array<i32>} : memref<1x8x32xf32, #tpu.memory_space<vmem>>, vector<1x8x32xf32>,
    return
  }
  func.func @transform_0(%arg0: i32) -> (i32, i32, i32) {
    %c0_i32 = arith.constant 0 : i32
    %c0_i32_0 = arith.constant 0 : i32
    %c0_i32_1 = arith.constant 0 : i32
    return %arg0, %c0_i32, %c0_i32_0 : i32, i32, i32
  }
  func.func @transform_1(%arg0: i32) -> (i32, i32, i32) {
    %c0_i32 = arith.constant 0 : i32
    %c0_i32_0 = arith.constant 0 : i32
    %c0_i32_1 = arith.constant 0 : i32
    return %arg0, %c0_i32, %c0_i32_0 : i32, i32, i32
  }
  func.func @transform_2(%arg0: i32) -> (i32, i32, i32) {
    %c0_i32 = arith.constant 0 : i32
    %c0_i32_0 = arith.constant 0 : i32
    %c0_i32_1 = arith.constant 0 : i32
    return %arg0, %c0_i32, %c0_i32_0 : i32, i32, i32
  }
  func.func @transform_3(%arg0: i32) -> (i32, i32) {
    %c0_i32 = arith.constant 0 : i32
    %c0_i32_0 = arith.constant 0 : i32
    %c0_i32_1 = arith.constant 0 : i32
    return %c0_i32, %c0_i32_0 : i32, i32
  }
  func.func @transform_4(%arg0: i32) -> (i32, i32) {
    %c0_i32 = arith.constant 0 : i32
    %c0_i32_0 = arith.constant 0 : i32
    %c0_i32_1 = arith.constant 0 : i32
    return %c0_i32, %c0_i32_0 : i32, i32
  }
  func.func @transform_5(%arg0: i32) -> (i32, i32) {
    %c0_i32 = arith.constant 0 : i32
    %c0_i32_0 = arith.constant 0 : i32
    %c0_i32_1 = arith.constant 0 : i32
    return %c0_i32, %c0_i32_0 : i32, i32
  }
  func.func @transform_6(%arg0: i32) -> (i32, i32) {
    %c0_i32 = arith.constant 0 : i32
    %c0_i32_0 = arith.constant 0 : i32
    %c0_i32_1 = arith.constant 0 : i32
    return %c0_i32, %c0_i32_0 : i32, i32
  }
  func.func @transform_7(%arg0: i32) -> (i32, i32) {
    %c0_i32 = arith.constant 0 : i32
    %c0_i32_0 = arith.constant 0 : i32
    %c0_i32_1 = arith.constant 0 : i32
    return %c0_i32, %c0_i32_0 : i32, i32
  }
  func.func @transform_8(%arg0: i32) -> (i32, i32) {
    %c0_i32 = arith.constant 0 : i32
    %c0_i32_0 = arith.constant 0 : i32
    %c0_i32_1 = arith.constant 0 : i32
    return %c0_i32, %c0_i32_0 : i32, i32
  }
  func.func @transform_9(%arg0: i32) -> (i32, i32) {
    %c0_i32 = arith.constant 0 : i32
    %c0_i32_0 = arith.constant 0 : i32
    %c0_i32_1 = arith.constant 0 : i32
    return %c0_i32, %c0_i32_0 : i32, i32
  }
  func.func @transform_10(%arg0: i32) -> (i32, i32) {
    %c0_i32 = arith.constant 0 : i32
    %c0_i32_0 = arith.constant 0 : i32
    %c0_i32_1 = arith.constant 0 : i32
    return %c0_i32, %c0_i32_0 : i32, i32
  }
  func.func @transform_11(%arg0: i32) -> (i32, i32, i32) {
    %c0_i32 = arith.constant 0 : i32
    %c0_i32_0 = arith.constant 0 : i32
    %c0_i32_1 = arith.constant 0 : i32
    return %arg0, %c0_i32, %c0_i32_0 : i32, i32, i32
  }
}

</mosaic_0001>

<bundles_post_ra>
// kernel: tpu_custom_call.1
= control target key start
LH: loop header
LB: loop body
LE: loop exit
PB: predicated region body
PF: predicated region fallthrough
CT: control target
= control target key end

     0   :  { %s2838_s0 = inlined_call_operand.hbm [shape: f32[2,8,32], index: 0, kind: input, shape index: {}]   ;;  %s2839_s1 = inlined_call_operand.hbm [shape: f32[2,8,32], index: 1, kind: input, shape index: {}]   ;;  %s2840_s2 = inlined_call_operand.hbm [shape: f32[2,8,32], index: 2, kind: input, shape index: {}]   ;;  %s2841_s3 = inlined_call_operand.hbm [shape: f32[32,32], index: 3, kind: input, shape index: {}]   ;;  %s2842_s4 = inlined_call_operand.hbm [shape: f32[32,32], index: 4, kind: input, shape index: {}]   ;;  %s2843_s5 = inlined_call_operand.hbm [shape: f32[32,32], index: 5, kind: input, shape index: {}]   ;;  %s2844_s6 = inlined_call_operand.hbm [shape: f32[32,32], index: 6, kind: input, shape index: {}]   ;;  %s2845_s7 = inlined_call_operand.vmem [shape: f32[1,32], index: 7, kind: input, shape index: {}]   ;;  %s2846_s8 = inlined_call_operand.vmem [shape: f32[1,32], index: 8, kind: input, shape index: {}]   ;;  %s2847_s9 = inlined_call_operand.vmem [shape: f32[1,32], index: 9, kind: input, shape index: {}]   ;;  %s2848_s10 = inlined_call_operand.vmem [shape: f32[1,32], index: 10, kind: input, shape index: {}]   ;;  %s2849_s11 = inlined_call_operand.hbm [shape: f32[2,8,32], index: 11, kind: output, shape index: {}]  }
   0x1   :  { %2875 = sst [smem:[#allocation26_spill]] %s2839_s1 }
   0x2   :  { %2876 = sst [smem:[#allocation27_spill]] %s2841_s3 }
   0x3   :  { %2877 = sst [smem:[#allocation28_spill]] %s2843_s5 }
   0x4   :  { %2878 = sst [smem:[#allocation29_spill]] %s2846_s8 }
   0x5   :  { %2879 = sst [smem:[#allocation30_spill]] %s2847_s9 }
   0x6   :  { %2880 = sst [smem:[#allocation31_spill]] %s2848_s10 }
   0x7   :  { %2881 = sst [smem:[#allocation32_spill]] %s2849_s11 }
   0x8   :  { %16 = vsyncpa [#allocation3], 0 }
   0x9   :  { %18 = vsyncpa [#allocation3 + $0x1], 0 }
   0xa   :  { %19 = vsyncpa [#allocation6], 0 }
   0xb   :  { %21 = vsyncpa [#allocation6 + $0x1], 0 }
   0xc   :  { %22 = vsyncpa [#allocation9], 0 }
   0xd   :  { %23 = vsyncpa [#allocation12], 0 }
   0xe   :  { %24 = vsyncpa [#allocation4], 0 }
   0xf   :  { %26 = vsyncpa [#allocation4 + $0x1], 0  ;;  %s2387_s17 = smov 0   ;;  %s2389_s18 = smov 0  }
  0x10   :  { %s2391_s19 = smov 0   ;;  %s2393_s20 = smov 0  }
  0x11 LB: > { %2882 = sst [smem:[#allocation20_spill]] %s2294_s17  ;;  %s2308_s21 = smov [#allocation8]   ;;  %s2306_s20 = sphi %s2393_s20, %s2924_s20   ;;  %s2302_s19 = sphi %s2391_s19, %s2928_s19   ;;  %s2298_s18 = sphi %s2389_s18, %s2927_s18   ;;  %s2294_s17 = sphi %s2387_s17, %s2926_s17  }
  0x12   : > { %2883 = sst [smem:[#allocation21_spill]] %s2306_s20  ;;  %s321_s22 = sshll.u32 %s2308_s21, 4  ;;  %s2413_s22 = int_to_ptr.vmem [resolvable:$true] %s321_s22 }
  0x13   : > { %s2408_s23 = sadd.s32 4294967295, %s2306_s20   ;;  %p1713_p0 = scmp.ge.s32.totalorder %s2306_s20, 1 }
  0x14   : > { %p2862_p1 = scmp.eq.s32.totalorder %s2408_s23, 0  ;;  %p309_p2 = scmp.lt.s32.totalorder %s2306_s20, 3 }
  0x15   : > { %s2309_s25 = smov [#allocation11]   ;;  %s2886_s3 = sld [smem:[#allocation27_spill]] }
  0x16   : > { %p2415_p3 = pnand %p1713_p0, %p309_p2  ;;  %s347_s26 = sshll.u32 %s2309_s25, 4  ;;  %s2428_s26 = int_to_ptr.vmem [resolvable:$true] %s347_s26 }
  0x18   : > { %s2884_s24 = scalar_select %p2415_p3, 1, 0 }
  0x19   : > { %p1926_p5 = pneg %p2415_p3 }
  0x1b   : > { %p2424_p6 = pnand %p1926_p5, %p2862_p1  ;;  %s2026_s30 = scalar_lea.hbm %s2886_s3, 512 }
  0x1c   : > { %p2027_p7 = scmp.ne.s32.totalorder %s2886_s3, %s2026_s30  ;;  %p2033_p11 = scmp.lt.u32.totalorder %s2026_s30, %s2886_s3 }
  0x1d   : > { %s2885_s27 = scalar_select %p2424_p6, 1, 0 }
  0x1e   : > { %p2438_p8 = pneg %p2424_p6 }
  0x20   : > { %s2887_s14 = scalar_select %p2438_p8, 1, 0 }
  0x21   : > { %p2029_p9 = pnand %p2438_p8, %p2027_p7 }
  0x23   : > { %p2030_p10 = pneg %p2029_p9 }
  0x25   : > { %p2035_p12 = pnand %p2033_p11, %p2030_p10 }
  0x27   : > { %2038 = shalt.err (!%p2035_p12)
}
  0x28   : > { %s2039_s21 = scalar_lea.vmem %s2413_s22, 512  ;;  %p2047_p5 = scmp.lt.s32.totalorder %s2413_s22, %s2413_s22 }
  0x29   : > { %p2040_p13 = scmp.ne.s32.totalorder %s2413_s22, %s2039_s21  ;;  %p2048_p4 = scmp.lt.s32.totalorder %s2039_s21, %s2039_s21 }
  0x2b   : > { %p2042_p0 = pnand %p2040_p13, %p2438_p8  ;;  %p2049_p7 = por %p2048_p4, %p2047_p5 }
  0x2d   : > { %p2043_p2 = pneg %p2042_p0 }
  0x2f   : > { %p2050_p9 = pnand %p2049_p7, %p2043_p2 }
  0x31   : > { %2053 = shalt.err (!%p2050_p9)
}
  0x32   : > { %s2852_s25 = smov 128   ;;  %s2854_s28 = smov 8  }
  0x33   : > { %1929 = dma.hbm_to_vmem [thread:$0]  (!%p2424_p6), %s2886_s3, 512, %s2413_s22, [#allocation9], %s2852_s25, %s2852_s25, %s2854_s28  }
  0x34   : > { %s2888_s5 = sld [smem:[#allocation28_spill]] }
  0x3a   : > { %s2054_s15 = scalar_lea.hbm %s2888_s5, 512 }
  0x3b   : > { %p2055_p4 = scmp.ne.s32.totalorder %s2888_s5, %s2054_s15  ;;  %p2061_p12 = scmp.lt.u32.totalorder %s2054_s15, %s2888_s5 }
  0x3d   : > { %p2057_p10 = pnand %p2055_p4, %p2438_p8 }
  0x3f   : > { %p2058_p11 = pneg %p2057_p10 }
  0x41   : > { %p2063_p13 = pnand %p2061_p12, %p2058_p11 }
  0x43   : > { %2066 = shalt.err (!%p2063_p13)
}
  0x44   : > { %s2067_s22 = scalar_lea.vmem %s2428_s26, 512  ;;  %p2075_p7 = scmp.lt.s32.totalorder %s2428_s26, %s2428_s26 }
  0x45   : > { %p2068_p0 = scmp.ne.s32.totalorder %s2428_s26, %s2067_s22  ;;  %p2076_p9 = scmp.lt.s32.totalorder %s2067_s22, %s2067_s22 }
  0x47   : > { %p2070_p2 = pnand %p2068_p0, %p2438_p8  ;;  %p2077_p4 = por %p2076_p9, %p2075_p7 }
  0x49   : > { %p2071_p5 = pneg %p2070_p2 }
  0x4b   : > { %p2078_p10 = pnand %p2077_p4, %p2071_p5 }
  0x4d   : > { %2081 = shalt.err (!%p2078_p10)
}
  0x4e   : > { %1935 = dma.hbm_to_vmem [thread:$0]  (!%p2424_p6), %s2888_s5, 512, %s2428_s26, [#allocation12], %s2852_s25, %s2852_s25, %s2854_s28  }
  0x4f   : > { %s1712_s29 = sadd.s32 4294967294, %s2306_s20   ;;  %s2490_s30 = sadd.s32 1, %s2306_s20  }
  0x50   : > { %2889 = sst [smem:[#allocation22_spill]] %s2490_s30  ;;  %s36_s12 = ssub.s32 %s2306_s20, %s2490_s30 }
  0x51   : > { %s39_s13 = sadd.s32 1, %s2302_s19  ;;  %p37_p11 = scmp.eq.s32.totalorder %s36_s12, 0 }
  0x52   : > { %p46_p12 = scmp.ne.s32.totalorder %s2302_s19, %s2298_s18  ;;  %p47_p13 = scmp.eq.s32.totalorder %s2306_s20, 0 }
  0x53   : > { %p52_p0 = scmp.ne.s32.totalorder %s2298_s18, %s2294_s17  ;;  %p296_p7 = scmp.eq.s32.totalorder %s2408_s23, 1 }
  0x54   : > { %s2501_s15 = scalar_select %p37_p11, %s2302_s19, %s39_s13  }
  0x55   : > { %p48_p2 = por %p47_p13, %p46_p12  ;;  %p2505_p5 = por %p2862_p1, %p52_p0 }
  0x56   : > { %2890 = sst [smem:[#allocation23_spill]] %s2501_s15  ;;  %p302_p9 = scmp.eq.s32.totalorder %s1712_s29, 1 }
  0x57   : > { %s2891_s16 = scalar_select %p2505_p5, 1, 0 }
  0x58   : > { %p1957_p4 = scmp.lt.s32.totalorder %s2306_s20, 2  ;;  %s2856_s26 = sand.u32 1, %s2302_s19  }
  0x59   : > { %p2512_p10 = por %p296_p7, %p46_p12  ;;  %p2516_p3 = por %p302_p9, %p52_p0 }
  0x5a   : > { %s2522_s10 = sshll.u32 %s2856_s26, 3  ;;  %s2525_s11 = sshll.u32 %s2306_s20, 7 }
  0x5b   : > { %s2892_s21 = scalar_select %p2512_p10, 1, 0 }
  0x5c   : > { %s2894_s22 = scalar_select %p2516_p3, 1, 0 }
  0x5d   : > { %2893 = sst [smem:[#allocation24_spill]] %s2892_s21  ;;  %p2527_p11 = pnand %p1957_p4, %p48_p2 }
  0x5e   : > { %2895 = sst [smem:[#allocation25_spill]] %s2894_s22  ;;  %s404_s29 = sand.u32 1, %s2306_s20  }
  0x5f   : > { %s2896_s12 = scalar_select %p2527_p11, 1, 0 }
  0x60   : > { %s2897_s1 = sld [smem:[#allocation26_spill]]  ;;  %s408_s26 = scalar_lea.vmem [#allocation5], %s2522_s10 }
  0x61   : > { %s415_s3 = sshll.u32 %s408_s26, 4  ;;  %s2312_s5 = smov [#allocation10]   ;;  %s2539_s3 = int_to_ptr.vmem [resolvable:$true] %s415_s3 }
  0x62   : > { %s2541_s15 = sshll.u32 %s2312_s5, 4  ;;  %s2543_s30 = scalar_lea.sflag [#allocation6], %s404_s29  ;;  %s335_s15 = int_to_ptr.vmem [resolvable:$true] %s2541_s15 }
  0x63   : > { %p2549_p13 = pneg %p2527_p11 }
  0x65   : > { %s2898_s25 = scalar_select %p2549_p13, 1, 0 }
  0x66   : > { %s2536_s28 = scalar_lea.hbm %s2897_s1, %s2525_s11  ;;  %s2087_s20 = scalar_lea.hbm %s2897_s1, 256 }
  0x67   : > { %s2082_s22 = scalar_lea.hbm %s2536_s28, 128  ;;  %p2088_p7 = scmp.lt.u32.totalorder %s2536_s28, %s2897_s1 }
  0x68   : > { %p2083_p12 = scmp.ne.s32.totalorder %s2536_s28, %s2082_s22  ;;  %p2089_p9 = scmp.lt.u32.totalorder %s2087_s20, %s2082_s22 }
  0x69   : > { %p2091_p1 = scmp.lt.u32.totalorder %s2082_s22, %s2536_s28 }
  0x6a   : > { %p2085_p0 = pnand %p2549_p13, %p2083_p12  ;;  %p2090_p4 = por %p2089_p9, %p2088_p7 }
  0x6c   : > { %p2086_p2 = pneg %p2085_p0  ;;  %p2092_p3 = por %p2091_p1, %p2090_p4 }
  0x6e   : > { %p2093_p10 = pnand %p2092_p3, %p2086_p2 }
  0x70   : > { %2096 = shalt.err (!%p2093_p10)
}
  0x71   : > { %s2097_s29 = scalar_lea.vmem %s2539_s3, 128  ;;  %s2313_s13 = smov [#allocation5]  }
  0x72   : > { %p2098_p12 = scmp.ne.s32.totalorder %s2539_s3, %s2097_s29  ;;  %s2102_s26 = sshll.u32 %s2313_s13, 4  ;;  %s2103_s26 = int_to_ptr.vmem [resolvable:$false] %s2102_s26 }
  0x73   : > { %s2104_s17 = scalar_lea.vmem %s2103_s26, 256  ;;  %p2105_p6 = scmp.lt.s32.totalorder %s2539_s3, %s2103_s26 }
  0x74   : > { %p2100_p0 = pnand %p2098_p12, %p2549_p13  ;;  %p2106_p8 = scmp.lt.s32.totalorder %s2104_s17, %s2097_s29 }
  0x76   : > { %p2101_p5 = pneg %p2100_p0  ;;  %p2107_p7 = por %p2106_p8, %p2105_p6 }
  0x78   : > { %p2108_p9 = pnand %p2107_p7, %p2101_p5 }
  0x7a   : > { %2111 = shalt.err (!%p2108_p9)
}
  0x7b   : > { %1945 = dma.hbm_to_vmem [thread:$0]  (!%p2527_p11), %s2536_s28, 128, %s2539_s3, %s2543_s30  }
  0x7c   : > { %s2112_s5 = scalar_lea.hbm %s2842_s4, 512  ;;  %p2899_p3 = scmp.ne.s32.totalorder %s2887_s14, 0 }
  0x7d   : > { %p2113_p1 = scmp.ne.s32.totalorder %s2842_s4, %s2112_s5  ;;  %p2119_p5 = scmp.lt.u32.totalorder %s2112_s5, %s2842_s4 }
  0x7f   : > { %p2115_p6 = pnand %p2113_p1, %p2899_p3 }
  0x81   : > { %p2116_p8 = pneg %p2115_p6 }
  0x83   : > { %p2121_p10 = pnand %p2119_p5, %p2116_p8 }
  0x85   : > { %2124 = shalt.err (!%p2121_p10)
}
  0x86   : > { %s2125_s17 = scalar_lea.vmem %s335_s15, 512  ;;  %p2133_p0 = scmp.lt.s32.totalorder %s335_s15, %s335_s15 }
  0x87   : > { %p2126_p2 = scmp.ne.s32.totalorder %s335_s15, %s2125_s17  ;;  %p2134_p7 = scmp.lt.s32.totalorder %s2125_s17, %s2125_s17 }
  0x89   : > { %p2128_p4 = pnand %p2126_p2, %p2899_p3  ;;  %p2135_p9 = por %p2134_p7, %p2133_p0 }
  0x8b   : > { %p2129_p12 = pneg %p2128_p4 }
  0x8d   : > { %p2136_p11 = pnand %p2135_p9, %p2129_p12 }
  0x8f   : > { %2139 = shalt.err (!%p2136_p11)
}
  0x90   : > { %p2900_p1 = scmp.ne.s32.totalorder %s2885_s27, 0  ;;  %s2901_s1 = smov 8  }
  0x91   : > { %s2902_s3 = smov 128   ;;  %s2314_s22 = smov [#allocation13]  }
  0x92   : > { %1932 = dma.hbm_to_vmem [thread:$0]  (!%p2900_p1), %s2842_s4, 512, %s335_s15, [#allocation9], %s2902_s3, %s2902_s3, %s2901_s1  }
  0x93   : > { %s360_s5 = sshll.u32 %s2314_s22, 4  ;;  %s2140_s26 = scalar_lea.hbm %s2844_s6, 512  ;;  %s361_s5 = int_to_ptr.vmem [resolvable:$true] %s360_s5 }
  0x94   : > { %p2141_p11 = scmp.ne.s32.totalorder %s2844_s6, %s2140_s26  ;;  %p2147_p5 = scmp.lt.u32.totalorder %s2140_s26, %s2844_s6 }
  0x96   : > { %p2143_p6 = pnand %p2141_p11, %p2899_p3 }
  0x98   : > { %p2144_p8 = pneg %p2143_p6 }
  0x9a   : > { %p2149_p10 = pnand %p2147_p5, %p2144_p8 }
  0x9c   : > { %2152 = shalt.err (!%p2149_p10)
}
  0x9d   : > { %s2153_s15 = scalar_lea.vmem %s361_s5, 512  ;;  %p2161_p0 = scmp.lt.s32.totalorder %s361_s5, %s361_s5 }
  0x9e   : > { %p2154_p2 = scmp.ne.s32.totalorder %s361_s5, %s2153_s15  ;;  %p2162_p7 = scmp.lt.s32.totalorder %s2153_s15, %s2153_s15 }
  0xa0   : > { %p2156_p4 = pnand %p2154_p2, %p2899_p3  ;;  %p2163_p9 = por %p2162_p7, %p2161_p0 }
  0xa2   : > { %p2157_p12 = pneg %p2156_p4 }
  0xa4   : > { %p2164_p13 = pnand %p2163_p9, %p2157_p12 }
  0xa6   : > { %2167 = shalt.err (!%p2164_p13)
}
  0xa7   : > { %1938 = dma.hbm_to_vmem [thread:$0]  (!%p2900_p1), %s2844_s6, 512, %s361_s5, [#allocation12], %s2902_s3, %s2902_s3, %s2901_s1  }
  0xa8   : > { %s2620_s28 = scalar_lea.hbm %s2838_s0, %s2525_s11  ;;  %s390_s27 = scalar_lea.vmem [#allocation2], %s2522_s10 }
  0xa9   : > { %s397_s20 = sshll.u32 %s390_s27, 4  ;;  %s2903_s22 = sand.u32 1, %s2302_s19   ;;  %s398_s20 = int_to_ptr.vmem [resolvable:$true] %s397_s20 }
  0xaa   : > { %s387_s13 = scalar_lea.sflag [#allocation3], %s2903_s22  ;;  %s2168_s29 = scalar_lea.hbm %s2620_s28, 128 }
  0xab   : > { %p2169_p13 = scmp.ne.s32.totalorder %s2620_s28, %s2168_s29  ;;  %p2904_p3 = scmp.ne.s32.totalorder %s2898_s25, 0 }
  0xac   : > { %s2173_s5 = scalar_lea.hbm %s2838_s0, 256  ;;  %p2174_p1 = scmp.lt.u32.totalorder %s2620_s28, %s2838_s0 }
  0xad   : > { %p2171_p11 = pnand %p2169_p13, %p2904_p3  ;;  %p2175_p8 = scmp.lt.u32.totalorder %s2173_s5, %s2168_s29 }
  0xae   : > { %p2177_p10 = scmp.lt.u32.totalorder %s2168_s29, %s2620_s28 }
  0xaf   : > { %p2172_p6 = pneg %p2171_p11  ;;  %p2176_p5 = por %p2175_p8, %p2174_p1 }
  0xb1   : > { %p2178_p2 = por %p2177_p10, %p2176_p5 }
  0xb3   : > { %p2179_p4 = pnand %p2178_p2, %p2172_p6 }
  0xb5   : > { %2182 = shalt.err (!%p2179_p4)
}
  0xb6   : > { %s2183_s15 = scalar_lea.vmem %s398_s20, 128  ;;  %s2315_s8 = smov [#allocation2]  }
  0xb7   : > { %p2184_p12 = scmp.ne.s32.totalorder %s398_s20, %s2183_s15  ;;  %s2188_s9 = sshll.u32 %s2315_s8, 4  ;;  %s2189_s9 = int_to_ptr.vmem [resolvable:$false] %s2188_s9 }
  0xb8   : > { %s2190_s14 = scalar_lea.vmem %s2189_s9, 256  ;;  %p2191_p9 = scmp.lt.s32.totalorder %s398_s20, %s2189_s9 }
  0xb9   : > { %p2186_p0 = pnand %p2184_p12, %p2904_p3  ;;  %p2192_p13 = scmp.lt.s32.totalorder %s2190_s14, %s2183_s15 }
  0xbb   : > { %p2187_p7 = pneg %p2186_p0  ;;  %p2193_p11 = por %p2192_p13, %p2191_p9 }
  0xbd   : > { %p2194_p1 = pnand %p2193_p11, %p2187_p7 }
  0xbf   : > { %2197 = shalt.err (!%p2194_p1)
}
  0xc0   : > { %p2905_p8 = scmp.ne.s32.totalorder %s2896_s12, 0  ;;  %s2646_s22 = scalar_lea.hbm %s2840_s2, %s2525_s11 }
  0xc1   : > { %s426_s29 = scalar_lea.vmem [#allocation7], %s2522_s10  ;;  %s2198_s3 = scalar_lea.hbm %s2646_s22, 128 }
  0xc2   : > { %1942 = dma.hbm_to_vmem [thread:$0]  (!%p2905_p8), %s2620_s28, 128, %s398_s20, %s387_s13  }
  0xc3   : > { %s433_s1 = sshll.u32 %s426_s29, 4  ;;  %p2199_p6 = scmp.ne.s32.totalorder %s2646_s22, %s2198_s3  ;;  %s434_s1 = int_to_ptr.vmem [resolvable:$true] %s433_s1 }
  0xc4   : > { %s2203_s28 = scalar_lea.hbm %s2840_s2, 256  ;;  %p2204_p2 = scmp.lt.u32.totalorder %s2646_s22, %s2840_s2 }
  0xc5   : > { %p2201_p5 = pnand %p2199_p6, %p2904_p3  ;;  %p2205_p4 = scmp.lt.u32.totalorder %s2203_s28, %s2198_s3 }
  0xc6   : > { %p2207_p0 = scmp.lt.u32.totalorder %s2198_s3, %s2646_s22 }
  0xc7   : > { %p2202_p10 = pneg %p2201_p5  ;;  %p2206_p12 = por %p2205_p4, %p2204_p2 }
  0xc9   : > { %p2208_p7 = por %p2207_p0, %p2206_p12 }
  0xcb   : > { %p2209_p9 = pnand %p2208_p7, %p2202_p10 }
  0xcd   : > { %2212 = shalt.err (!%p2209_p9)
}
  0xce   : > { %s2213_s10 = scalar_lea.vmem %s434_s1, 128  ;;  %s2316_s11 = smov [#allocation7]  }
  0xcf   : > { %p2214_p13 = scmp.ne.s32.totalorder %s434_s1, %s2213_s10  ;;  %s2218_s17 = sshll.u32 %s2316_s11, 4  ;;  %s2219_s17 = int_to_ptr.vmem [resolvable:$false] %s2218_s17 }
  0xd0   : > { %s2220_s15 = scalar_lea.vmem %s2219_s17, 256  ;;  %p2221_p6 = scmp.lt.s32.totalorder %s434_s1, %s2219_s17 }
  0xd1   : > { %p2216_p11 = pnand %p2214_p13, %p2904_p3  ;;  %p2222_p5 = scmp.lt.s32.totalorder %s2220_s15, %s2213_s10 }
  0xd3   : > { %p2217_p1 = pneg %p2216_p11  ;;  %p2223_p8 = por %p2222_p5, %p2221_p6 }
  0xd5   : > { %p2224_p2 = pnand %p2223_p8, %p2217_p1 }
  0xd7   : > { %2227 = shalt.err (!%p2224_p2)
}
  0xd8   : > { %p2906_p4 = scmp.ne.s32.totalorder %s2896_s12, 0  ;;  %p2907_p10 = scmp.ne.s32.totalorder %s2884_s24, 0 }
  0xd9   : > { %s2670_s25 = sand.u32 (!%p2907_p10), 1, %s2298_s18   ;;  %p2908_p3 = scmp.ne.s32.totalorder (!%p2907_p10), %s2891_s16, 0 }
  0xda   : > { %1948 = dma.hbm_to_vmem [thread:$0]  (!%p2906_p4), %s2646_s22, 128, %s434_s1, %s2543_s30  }
  0xdb   : > { %442 = sbr.rel (%p2907_p10) target bundleno = 1774 (0x6ee), region = 64  ;;  %s2673_s8 = sshll.u32 (!%p2907_p10), %s2670_s25, 3 }
  0xdc   : > { %s445_s9 = scalar_lea.sflag (!%p2907_p10), [#allocation3], %s2670_s25  ;;  %s448_s14 = scalar_lea.vmem (!%p2907_p10), [#allocation2], %s2673_s8 }
  0xe2   : > { %2273 = dma.done.wait (%p2908_p3), %s445_s9, 128  }
  0xe3   : > { %2275 = vsyncadd (%p2908_p3), %s445_s9, 4294967168  ;;  %s453_s24 = sand.u32 1, %s2408_s23   ;;  %s457_s12 = scalar_lea.vmem [#allocation5], %s2673_s8 }
  0xe4   : > { %s454_s30 = scalar_lea.sflag [#allocation6], %s453_s24 }
  0xe5   : > { %2277 = dma.done.wait (%p2908_p3), %s454_s30, 256  }
  0xe6   : > { %2279 = vsyncadd (%p2908_p3), %s454_s30, 4294967040  ;;  %s466_s21 = scalar_lea.vmem [#allocation7], %s2673_s8  ;;  %p2909_p8 = scmp.eq.s32.totalorder %s2408_s23, 0 }
  0xe8   : > { %2281 = dma.done.wait (%p2909_p8), [#allocation9], 1024   ;;  %p2910_p12 = pmov %p2909_p8 }
  0xe9   : > { %p2911_p0 = pmov %p2909_p8 }
  0xea   : > { %2283 = vsyncadd (%p2910_p12), [#allocation9], 4294966272 }
  0xeb   : > { %2285 = dma.done.wait (%p2911_p0), [#allocation12], 1024   ;;  %p2912_p7 = pmov %p2911_p0 }
  0xec   : > { %v2317_v0 = vmov 0.0|0.0   ;;  %vm2318_vm0 = vmmov 0   ;;  %v2319_v1 = vmov 0.0   ;;  %v534_v2 = vld [vmem:[#allocation8] sm:$0xff]  ;;  %v535_v3 = vld [vmem:[#allocation8 + $0x8] sm:$0xff]  ;;  %v536_v7 = vld [vmem:[#allocation8 + $0x10] sm:$0xff] }
  0xed   : > { %2287 = vsyncadd (%p2912_p7), [#allocation12], 4294966272  ;;  %1878 = vmatprep.subr.bf16.mxu0 %v2317_v0  ;;  %1884 = vmatprep.subr.bf16.mxu1 %v2317_v0  ;;  %v619_v4 = vld [vmem:[#allocation10] sm:$0xff]  ;;  %v1879_v5 = vpack.c.bf16 %v535_v3, %v534_v2  ;;  %v620_v6 = vld [vmem:[#allocation10 + $0x8] sm:$0xff]  ;;  %vm545_vm1 = vcmask 261120   ;;  %s2913_s1 = sld [smem:[#allocation29_spill]] }
  0xee   : > { %1802 = vmatprep.mubr.msk.f32.mxu0 %vm2318_vm0, %v2319_v1  ;;  %1813 = vmatprep.mubr.msk.f32.mxu1 %vm2318_vm0, %v2319_v1  ;;  %v537_v8 = vld [vmem:[#allocation8 + $0x18] sm:$0xff]  ;;  %v1885_v9 = vpack.c.bf16 %v620_v6, %v619_v4  ;;  %v621_v10 = vld [vmem:[#allocation10 + $0x10] sm:$0xff]  ;;  %v532_v15 = vld [vmem:[%s457_s12] sm:$0xff]  ;;  %vm788_vm2 = vcmask 64512   ;;  %s2320_s3 = smov 120   ;;  %s2321_s5 = smov 112  }
  0xef   : > { %v622_v11 = vld [vmem:[#allocation10 + $0x18] sm:$0xff]  ;;  %1880 = vmatpush3.bf16.msra.mxu0 %v1879_v5  ;;  %v1882_v12 = vpack.c.bf16 %v537_v8, %v536_v7  ;;  %v703_v16 = vld [vmem:[#allocation11] sm:$0xff]  ;;  %v704_v17 = vld [vmem:[#allocation11 + $0x8] sm:$0xff]  ;;  %s2322_s26 = smov 104   ;;  %s2914_s13 = sld [smem:[#allocation30_spill]]  ;;  %vm1458_vm3 = vcmask 130048  }
  0xf0   : > { %1886 = vmatpush3.bf16.msra.mxu1 %v1885_v9  ;;  %1881 = vmatprep.subr.bf16.mxu0 %v2317_v0  ;;  %v1888_v13 = vpack.c.bf16 %v622_v11, %v621_v10  ;;  %v531_v14 = vld [vmem:[%s448_s14] sm:$0xff]  ;;  %v1891_v19 = vpack.c.bf16 %v704_v17, %v703_v16  ;;  %s2323_s10 = smov 8   ;;  %s2324_s11 = smov 16   ;;  %vm1460_vm4 = vcmask 195584  }
  0xf1   : > { %1887 = vmatprep.subr.bf16.mxu1 %v2317_v0  ;;  %v705_v18 = vld [vmem:[#allocation11 + $0x10] sm:$0xff]  ;;  %v706_v20 = vld [vmem:[#allocation11 + $0x18] sm:$0xff]  ;;  %s2325_s17 = smov 24   ;;  %s2915_s15 = sld [smem:[#allocation24_spill]] }
  0xf2   : > { %v1894_v21 = vpack.c.bf16 %v706_v20, %v705_v18  ;;  %v533_v22 = vld [vmem:[%s466_s21] sm:$0xff]  ;;  %v1462_v18 = vld [vmem:[#allocation13] sm:$0xff]  ;;  %s2916_s24 = sld [smem:[#allocation31_spill]]  ;;  %s1755_s30 = sshll.u32 %s2408_s23, 7 }
  0xf3   : > { %1883 = vmatpush3.bf16.msra.mxu0 %v1882_v12  ;;  %v1734_v23 = vld [vmem:[%s2845_s7] ss:$0 sm:$0xff]  ;;  %s530_s12 = scalar_lea.vmem [#allocation14], %s2673_s8  ;;  %s2917_s22 = sld [smem:[#allocation32_spill]] }
  0xf4   : > { %1889 = vmatpush3.bf16.msra.mxu1 %v1888_v13  ;;  %1890 = vmatprep.subr.bf16.mxu0 %v2317_v0  ;;  %v1736_v24 = vld [vmem:[%s2913_s1] ss:$0 sm:$0xff]  ;;  %s1561_s21 = sshll.u32 %s530_s12, 4  ;;  %s1548_s1 = scalar_lea.sflag [#allocation4], %s2670_s25  ;;  %s2795_s21 = int_to_ptr.vmem [resolvable:$true] %s1561_s21 }
  0xf5   : > { %1827 = vmatprep.subr.mxu1 %v2319_v1  ;;  %v1738_v32 = vld [vmem:[%s2914_s13] ss:$0 sm:$0xff]  ;;  %s2326_s23 = smov [#allocation14]  }
  0xf6   : > { %1803 = vmatmul.mubr.msk.f32.vlgmr.msra.gmra.mrb[0].mxu0 %vm545_vm1, %v531_v14  ;;  %s2232_s8 = sshll.u32 %s2326_s23, 4  ;;  %s2233_s8 = int_to_ptr.vmem [resolvable:$false] %s2232_s8 }
  0xf7   : > { %1814 = vmatmul.mubr.msk.f32.vlgmr.msra.gmra.mrb[0].mxu1 %vm545_vm1, %v532_v15  ;;  %1824 = vmatprep.mubr.msk.f32.mxu0 %vm2318_vm0, %v2319_v1  ;;  %p2918_p13 = scmp.ne.s32.totalorder %s2915_s15, 0  ;;  %p2235_p6 = scmp.lt.s32.totalorder %s2795_s21, %s2233_s8 }
  0xf8   : > { %1829 = vmatprep.mubr.msk.f32.mxu1 %vm2318_vm0, %v2319_v1  ;;  %1892 = vmatpush3.bf16.msra.mxu0 %v1891_v19  ;;  %v1463_v19 = vld [vmem:[#allocation13 + $0x8] sm:$0xff] }
  0xf9   : > { %1893 = vmatprep.subr.bf16.mxu0 %v2317_v0  ;;  %s2793_s29 = scalar_lea.hbm %s2917_s22, %s1755_s30 }
  0xfc   : > { %1895 = vmatpush3.bf16.msra.mxu0 %v1894_v21  ;;  %v1897_v21 = vpack.c.bf16 %v1463_v19, %v1462_v18 }
  0xfd   : > { %1847 = vmatprep.subr.mxu0 %v2319_v1 }
  0xff   : > { %1825 = vmatmul.mubr.msk.f32.vlgmr.msra.gmra.mrb[2].mxu0 %vm545_vm1, %v533_v22  ;;  %v1464_v22 = vld [vmem:[#allocation13 + $0x10] sm:$0xff] }
 0x100   : > { %1849 = vmatprep.mubr.msk.f32.mxu0 %vm2318_vm0, %v2319_v1 }
 0x1c9   : > { %v615_v25 = vpop.f32.mrb[0].mxu0 }
 0x1ca   : > { %v616_v26 = vadd.f32 %v1734_v23, %v615_v25  ;;  %v699_v27 = vpop.f32.mrb[0].mxu1  ;;  %v1804_v28 = vpop.f32.mrb[1].mxu0  ;;  %v1465_v23 = vld [vmem:[#allocation13 + $0x18] sm:$0xff] }
 0x1cb   : > { %v700_v29 = vadd.f32 %v1736_v24, %v699_v27  ;;  %v1815_v30 = vpop.f32.mrb[1].mxu1  ;;  %v1900_v25 = vpack.c.bf16 %v1465_v23, %v1464_v22 }
 0x1cc   : > { %v787_v31 = vmul.f32 0.35355338, %v616_v26 }
 0x1cd   : > { %1828 = vmatpush3.xpose.msk.msra.mxu1 %vm788_vm2, %v700_v29 }
 0x1ce   : > { %949 = vrot.lane.b32.xlu1 %v787_v31, %s2320_s3  ;;  %1832 = vmatprep.subr.mxu1 %v2319_v1 }
 0x1d0   : > { %1830 = vmatmul.mubr.msk.f32.vlgmr.msra.gmra.mrb[2].mxu1 %vm788_vm2, %v787_v31 }
 0x1d1   : > { %1834 = vmatprep.mubr.msk.f32.mxu1 %vm2318_vm0, %v2319_v1 }
 0x1d2   : > { %1117 = vrot.lane.b32.xlu1 %v700_v29, %s2321_s5  ;;  %v783_v33 = vpop.f32.mrb[2].mxu0 }
 0x1d3   : > { %v784_v34 = vadd.f32 %v1738_v32, %v783_v33  ;;  %v1826_v35 = vpop.f32.mrb[3].mxu0 }
 0x1d5   : > { %1833 = vmatpush3.msra.mxu1 %v784_v34 }
 0x1d6   : > { %1115 = vrot.lane.b32.xlu1 %v787_v31, %s2321_s5  ;;  %1837 = vmatprep.subr.mxu1 %v2319_v1 }
 0x1da   : > { %1282 = vrot.lane.b32.xlu1 %v700_v29, %s2322_s26 }
 0x1de   : > { %1280 = vrot.lane.b32.xlu1 %v787_v31, %s2322_s26 }
 0x1e2   : > { %1203 = vrot.lane.b32.xlu1 %v784_v34, %s2321_s5  ;;  %s2234_s5 = scalar_lea.vmem %s2233_s8, 256 }
 0x240   : > { %v950_v36 = vpop.permute.xlu1 %949 }
 0x244   : > { %v1118_v37 = vpop.permute.xlu1 %1117 }
 0x245   : > { %1848 = vmatpush3.xpose.msk.msra.mxu0 %vm788_vm2, %v1118_v37 }
 0x246   : > { %1857 = vmatprep.subr.mxu0 %v2319_v1 }
 0x248   : > { %v1116_v38 = vpop.permute.xlu1 %1115 }
 0x249   : > { %1850 = vmatmul.mubr.msk.f32.vlgmr.msra.gmra.mrb[4].mxu0 %vm788_vm2, %v1116_v38 }
 0x24a   : > { %1859 = vmatprep.mubr.msk.f32.mxu0 %vm2318_vm0, %v2319_v1 }
 0x24c   : > { %v1283_v39 = vpop.permute.xlu1 %1282 }
 0x24d   : > { %1858 = vmatpush3.xpose.msk.msra.mxu0 %vm788_vm2, %v1283_v39 }
 0x24e   : > { %1896 = vmatprep.subr.bf16.mxu0 %v2317_v0 }
 0x250   : > { %v1281_v40 = vpop.permute.xlu1 %1280 }
 0x251   : > { %1860 = vmatmul.mubr.msk.f32.vlgmr.msra.gmra.mrb[6].mxu0 %vm788_vm2, %v1281_v40 }
 0x252   : > { %1875 = vmatprep.mubr.msk.f32.mxu0 %vm2318_vm0, %v2319_v1  ;;  %1898 = vmatpush3.bf16.msra.mxu0 %v1897_v21 }
 0x253   : > { %1899 = vmatprep.subr.bf16.mxu0 %v2317_v0 }
 0x254   : > { %v1204_v4 = vpop.permute.xlu1 %1203 }
 0x256   : > { %1901 = vmatpush3.bf16.msra.mxu0 %v1900_v25 }
 0x2a3   : > { %v861_v41 = vpop.f32.mrb[2].mxu1 }
 0x2a4   : > { %v1831_v42 = vpop.f32.mrb[3].mxu1  ;;  %v865_v43 = vsel %vm788_vm2, %v861_v41, -inf }
 0x2a5   : > { %866 = vmax.xlane.f32.xlu0 %v865_v43 }
 0x2bb   : > { %951 = vrot.lane.b32.xlu0 %v700_v29, %s2320_s3 }
 0x31c   : > { %v1189_v44 = vpop.f32.mrb[4].mxu0 }
 0x31d   : > { %v1851_v45 = vpop.f32.mrb[5].mxu0  ;;  %v1193_v46 = vsel %vm788_vm2, %v1189_v44, -inf }
 0x31e   : > { %1194 = vmax.xlane.f32.xlu0 %v1193_v46  ;;  %v1752_v45 = vld [vmem:[%s2916_s24] ss:$0 sm:$0xff] }
 0x324   : > { %v1354_v47 = vpop.f32.mrb[6].mxu0 }
 0x325   : > { %v1861_v48 = vpop.f32.mrb[7].mxu0  ;;  %v1358_v49 = vsel %vm788_vm2, %v1354_v47, -inf }
 0x326   : > { %1359 = vmax.xlane.f32.xlu1 %v1358_v49 }
 0x332   : > { %v867_v50 = vpop.xlane.xlu0 %866 }
 0x333   : > { %v868_v51 = vsub.f32 %v861_v41, %v867_v50 }
 0x334   : > { %1038 = vrot.lane.b32.xlu0 %v784_v34, %s2320_s3  ;;  %s2228_s3 = scalar_lea.vmem %s2795_s21, 128 }
 0x335   : > { %v869_v52 = vmul.f32 1.442695, %v868_v51  ;;  %p2229_p9 = scmp.ne.s32.totalorder %s2795_s21, %s2228_s3  ;;  %p2236_p5 = scmp.lt.s32.totalorder %s2234_s5, %s2228_s3 }
 0x336   : > { %v952_v54 = vpop.permute.xlu0 %951 }
 0x337   : > { %2010 = vpow2.f32 %v869_v52  ;;  %p2230_p11 = pnand %p2229_p9, %p2918_p13  ;;  %p2237_p2 = por %p2236_p5, %p2235_p6 }
 0x339   : > { %p2231_p1 = pneg %p2230_p11 }
 0x33b   : > { %p2238_p4 = pnand %p2237_p2, %p2231_p1 }
 0x341   : > { %v2011_v53 = vpop.eup %2010 }
 0x342   : > { %1835 = vmatmul.mubr.msk.f32.vlgmr.msra.gmra.mrb[4].mxu1 %vm788_vm2, %v2011_v53  ;;  %v871_v16 = vsel %vm788_vm2, %v2011_v53, 0.0 }
 0x343   : > { %1838 = vmatpush3.xpose.msk.msra.mxu1 %vm788_vm2, %v952_v54  ;;  %1839 = vmatprep.mubr.msk.f32.mxu1 %vm2318_vm0, %v2319_v1 }
 0x344   : > { %1842 = vmatprep.subr.mxu1 %v2319_v1 }
 0x346   : > { %1840 = vmatmul.mubr.msk.f32.vlgmr.msra.gmra.mrb[6].mxu1 %vm788_vm2, %v950_v36 }
 0x347   : > { %1844 = vmatprep.mubr.msk.f32.mxu1 %vm2318_vm0, %v2319_v1 }
 0x3ab   : > { %v1195_v55 = vpop.xlane.xlu0 %1194 }
 0x3ac   : > { %v1196_v56 = vsub.f32 %v1189_v44, %v1195_v55 }
 0x3ae   : > { %v1197_v63 = vmul.f32 1.442695, %v1196_v56 }
 0x3af   : > { %v1039_v57 = vpop.permute.xlu0 %1038 }
 0x3b0   : > { %1843 = vmatpush3.msra.mxu1 %v1039_v57  ;;  %2012 = vpow2.f32 %v1197_v63 }
 0x3b1   : > { %1852 = vmatprep.subr.mxu1 %v2319_v1 }
 0x3b3   : > { %v1360_v5 = vpop.xlane.xlu1 %1359 }
 0x3b4   : > { %v1361_v6 = vsub.f32 %v1354_v47, %v1360_v5 }
 0x3b6   : > { %v1362_v9 = vmul.f32 1.442695, %v1361_v6 }
 0x3ba   : > { %v2013_v2 = vpop.eup %2012 }
 0x3bb   : > { %v1199_v3 = vsel %vm788_vm2, %v2013_v2, 0.0 }
 0x415   : > { %v2765_v58 = vpop.f32.mrb[4].mxu1 }
 0x416   : > { %v1836_v59 = vpop.f32.mrb[5].mxu1 }
 0x419   : > { %v1023_v60 = vpop.f32.mrb[6].mxu1 }
 0x41a   : > { %v1841_v61 = vpop.f32.mrb[7].mxu1  ;;  %v1027_v62 = vsel %vm788_vm2, %v1023_v60, -inf }
 0x41b   : > { %1028 = vmax.xlane.f32.xlu1 %v1027_v62 }
 0x42c   : > { %1368 = vrot.lane.b32.xlu1 %v784_v34, %s2322_s26 }
 0x450   : > { %1200 = vadd.xlane.f32.xlu1 %v1199_v3 }
 0x4a8   : > { %v1029_v7 = vpop.xlane.xlu1 %1028 }
 0x4a9   : > { %v1030_v8 = vsub.f32 %v1023_v60, %v1029_v7 }
 0x4ab   : > { %v1031_v10 = vmul.f32 1.442695, %v1030_v8 }
 0x4ac   : > { %v1369_v14 = vpop.permute.xlu1 %1368 }
 0x4ad   : > { %2014 = vpow2.f32 %v1031_v10 }
 0x4ae   : > { %2016 = vpow2.f32 %v1362_v9 }
 0x4b7   : > { %v2015_v11 = vpop.eup %2014 }
 0x4b8   : > { %1845 = vmatmul.mubr.msk.f32.vlgmr.msra.gmra.mrb[8].mxu1 %vm788_vm2, %v2015_v11  ;;  %v1033_v12 = vsel %vm788_vm2, %v2015_v11, 0.0  ;;  %v2017_v13 = vpop.eup %2016 }
 0x4b9   : > { %1853 = vmatpush3.msra.mxu1 %v1204_v4  ;;  %1034 = vadd.xlane.f32.xlu0 %v1033_v12  ;;  %v1364_v15 = vsel %vm788_vm2, %v2017_v13, 0.0 }
 0x4ba   : > { %1854 = vmatprep.mubr.msk.f32.mxu1 %vm2318_vm0, %v2319_v1  ;;  %1862 = vmatprep.subr.mxu1 %v2319_v1 }
 0x4bc   : > { %1855 = vmatmul.mubr.msk.f32.vlgmr.msra.gmra.mrb[10].mxu1 %vm788_vm2, %v2013_v2 }
 0x4bd   : > { %1863 = vmatpush3.msra.mxu1 %v1369_v14  ;;  %1365 = vadd.xlane.f32.xlu0 %v1364_v15 }
 0x4be   : > { %1864 = vmatprep.mubr.msk.f32.mxu1 %vm2318_vm0, %v2319_v1 }
 0x4c0   : > { %1865 = vmatmul.mubr.msk.f32.vlgmr.msra.gmra.mrb[12].mxu1 %vm788_vm2, %v2017_v13 }
 0x4c1   : > { %872 = vadd.xlane.f32.xlu0 %v871_v16 }
 0x4dd   : > { %v1201_v20 = vpop.xlane.xlu1 %1200 }
 0x546   : > { %v1035_v17 = vpop.xlane.xlu0 %1034 }
 0x547   : > { %2018 = vrcp.f32 %v1035_v17 }
 0x548   : > { %2020 = vrcp.f32 %v1201_v20 }
 0x54a   : > { %v1366_v24 = vpop.xlane.xlu0 %1365 }
 0x54b   : > { %2022 = vrcp.f32 %v1366_v24 }
 0x54e   : > { %v873_v36 = vpop.xlane.xlu0 %872 }
 0x54f   : > { %2024 = vrcp.f32 %v873_v36 }
 0x551   : > { %v2019_v1 = vpop.eup %2018 }
 0x552   : > { %v2021_v29 = vpop.eup %2020 }
 0x555   : > { %v2023_v33 = vpop.eup %2022 }
 0x559   : > { %v2025_v37 = vpop.eup %2024 }
 0x55a   : > { %v948_v39 = vmul.f32 %v2025_v37, %v2765_v58 }
 0x58b   : > { %v1110_v26 = vpop.f32.mrb[8].mxu1 }
 0x58c   : > { %v1114_v27 = vmul.f32 %v2019_v1, %v1110_v26  ;;  %v1846_v28 = vpop.f32.mrb[9].mxu1 }
 0x58e   : > { %1446 = vrot.lane.b32.xlu1 %v1114_v27, %s2323_s10 }
 0x58f   : > { %v1275_v30 = vpop.f32.mrb[10].mxu1 }
 0x590   : > { %v1279_v31 = vmul.f32 %v2021_v29, %v1275_v30  ;;  %v1856_v32 = vpop.f32.mrb[11].mxu1 }
 0x592   : > { %1450 = vrot.lane.b32.xlu0 %v1279_v31, %s2324_s11 }
 0x593   : > { %v1440_v0 = vpop.f32.mrb[12].mxu1 }
 0x594   : > { %v1444_v34 = vmul.f32 %v2023_v33, %v1440_v0  ;;  %v1866_v35 = vpop.f32.mrb[13].mxu1 }
 0x596   : > { %1454 = vrot.lane.b32.xlu1 %v1444_v34, %s2325_s17 }
 0x600   : > { %v1447_v38 = vpop.permute.xlu1 %1446 }
 0x601   : > { %v1457_v41 = vsel %vm788_vm2, %v948_v39, %v1447_v38 }
 0x604   : > { %v1451_v40 = vpop.permute.xlu0 %1450 }
 0x605   : > { %v1459_v42 = vsel %vm1458_vm3, %v1457_v41, %v1451_v40 }
 0x608   : > { %v1455_v43 = vpop.permute.xlu1 %1454 }
 0x609   : > { %v1461_v44 = vsel %vm1460_vm4, %v1459_v42, %v1455_v43 }
 0x60a   : > { %1876 = vmatmul.mubr.msk.f32.vlgmr.msra.gmra.mrb[8].mxu0 %vm545_vm1, %v1461_v44 }
 0x6dd   : > { %v1542_v46 = vpop.f32.mrb[8].mxu0 }
 0x6de   : > { %v1543_v47 = vadd.f32 %v1752_v45, %v1542_v46  ;;  %v1877_v48 = vpop.f32.mrb[9].mxu0 }
 0x6e0   : > { %1546 = vst.msk [vmem:[%s530_s12] sm:$0xff] %vm545_vm1, %v1543_v47 }
 0x6e1   : > { %2241 = shalt.err (!%p2238_p4)
}
 0x6e2   : > { %s2242_s25 = scalar_lea.hbm %s2793_s29, 128  ;;  %s2246_s20 = scalar_lea.hbm %s2917_s22, 256 }
 0x6e3   : > { %p2243_p10 = scmp.ne.s32.totalorder %s2793_s29, %s2242_s25  ;;  %p2247_p12 = scmp.lt.u32.totalorder %s2793_s29, %s2917_s22 }
 0x6e4   : > { %p2248_p0 = scmp.lt.u32.totalorder %s2246_s20, %s2242_s25  ;;  %p2250_p9 = scmp.lt.u32.totalorder %s2242_s25, %s2793_s29 }
 0x6e5   : > { %p2244_p3 = pnand %p2243_p10, %p2918_p13 }
 0x6e6   : > { %p2249_p7 = por %p2248_p0, %p2247_p12 }
 0x6e7   : > { %p2245_p8 = pneg %p2244_p3 }
 0x6e8   : > { %p2251_p11 = por %p2250_p9, %p2249_p7 }
 0x6ea   : > { %p2252_p1 = pnand %p2251_p11, %p2245_p8 }
 0x6ec   : > { %2255 = shalt.err (!%p2252_p1)
}
 0x6ed   : > { %1924 = dma.vmem_to_hbm [thread:$0]  (%p2918_p13), %s2795_s21, 128, %s2793_s29, %s1548_s1  }
 0x6ee PF: > { %s2919_s11 = sld [smem:[#allocation20_spill]]  ;;  %s2920_s17 = sld [smem:[#allocation25_spill]] }
 0x6ef   : > { %s2921_s9 = sld [smem:[#allocation21_spill]] }
 0x6f4   : > { %s1573_s14 = sand.u32 1, %s2919_s11   ;;  %p2922_p6 = scmp.ne.s32.totalorder %s2920_s17, 0 }
 0x6f5   : > { %p2923_p5 = scmp.ge.s32.totalorder %s2921_s9, 2  ;;  %s1574_s24 = scalar_lea.sflag [#allocation4], %s1573_s14 }
 0x6f7   : > { %p1950_p2 = pnand %p2923_p5, %p2922_p6 }
 0x6f9   : > { %2289 = dma.done.wait (!%p1950_p2), %s1574_s24, 128  }
 0x6fa   : > { %2291 = vsyncadd (!%p1950_p2), %s1574_s24, 4294967168  ;;  %s2924_s20 = sld [smem:[#allocation22_spill]]  ;;  %s2925_s30 = sld [smem:[#allocation23_spill]] }
 0x6fb   : > { %s2926_s17 = smov %s2298_s18  ;;  %s2927_s18 = smov %s2302_s19 }
 0x700   : > { %p29_p4 = scmp.ge.s32.totalorder %s2924_s20, 4   ;;  %s2928_s19 = smov %s2925_s30 }
 0x702   :  { %31 = sbr.rel (!%p29_p4) target bundleno = 17 (0x11), region = 149 }
 0x709   :  { %1579 = vsyncpa [#allocation3], 1 }
 0x70a   :  { %1581 = vsyncpa [#allocation3 + $0x1], 1 }
 0x70b   :  { %1582 = vsyncpa [#allocation6], 1 }
 0x70c   :  { %1584 = vsyncpa [#allocation6 + $0x1], 1 }
 0x70d   :  { %1585 = vsyncpa [#allocation9], 1 }
 0x70e   :  { %1586 = vsyncpa [#allocation12], 1 }
 0x70f   :  { %1587 = vsyncpa [#allocation4], 1 }
 0x710   :  { %1589 = vsyncpa [#allocation4 + $0x1], 1 }

</bundles_post_ra>
